<compile_context>
chip_gen: v5e
topology: v5e:2x2
jax: 0.10.0
libtpu: 0.0.40
codegen_flags: <defaults>
</compile_context>

<pallas_src>
import math

import jax
import jax.numpy as jnp
from jax.experimental import pallas as pl

# Small synthetic transformer config (logical sizes).
B, S, D, H, F = 2, 8, 32, 4, 64            # batch, seq, hidden, heads, ffn
HD = D // H                                 # head dim (8)
BS = B * S                                  # fused token dim (16)
DP = 128                                    # hidden padded to a full lane tile
FP = 128                                    # ffn padded to a full lane tile
QKVP = 128                                  # 3*D = 96 padded to a full lane tile
EPS = 1e-5


def _gelu(x):
    # tanh approximation of GELU (same as HF "gelu_new").
    c = math.sqrt(2.0 / math.pi)
    return 0.5 * x * (1.0 + jnp.tanh(c * (x + 0.044715 * x * x * x)))


def _layernorm_padded(x, g, b):
    # LayerNorm over the D valid lanes of a DP(=128)-lane padded activation.
    # Pad lanes of `x` are exactly zero on entry, so sum(x)/D and sum(x*x)/D
    # are already statistics over the valid lanes only (no mask needed).
    # gamma/beta pads are zero, so pad lanes stay exactly zero on exit.
    mu = jnp.sum(x, axis=-1, keepdims=True) * (1.0 / D)
    var = jnp.sum(x * x, axis=-1, keepdims=True) * (1.0 / D) - mu * mu
    var = jnp.maximum(var, 0.0)
    return (x - mu) * jax.lax.rsqrt(var + EPS) * g + b


def _softmax(s):
    m = jnp.max(s, axis=-1, keepdims=True)
    e = jnp.exp(s - m)
    # approx reciprocal lowers to the EUP slot (effectively free next to exp).
    return e * pl.reciprocal(jnp.sum(e, axis=-1, keepdims=True), approx=True)


def transformer_block_kernel(
    x_ref,                                   # (BS, DP)   f32 padded activations
    wqkv_ref, bqkv_ref,                      # (DP, QKVP) bf16, (1, QKVP) f32
    wo_ref, bo_ref,                          # (D, DP)    bf16, (1, DP)   f32
    w1_ref, b1_ref,                          # (DP, FP)   bf16, (1, FP)   f32
    w2_ref, b2_ref,                          # (FP, DP)   bf16, (1, DP)   f32
    ln1g_ref, ln1b_ref, ln2g_ref, ln2b_ref,  # (1, DP)    f32
    o_ref,                                   # (BS, DP)   f32
):
    x = x_ref[...]                            # unmasked (8,128)-tiled load

    # ---- attention sub-block -------------------------------------------
    h1 = _layernorm_padded(x, ln1g_ref[...], ln1b_ref[...])       # (BS, DP)

    # Fused Q/K/V projection: one (16,128)x(128,128) MXU matmul.  The
    # 1/sqrt(HD) score scale is pre-folded into the Q columns and bias.
    qkv = jnp.dot(h1.astype(jnp.bfloat16), wqkv_ref[...],
                  preferred_element_type=jnp.float32) + bqkv_ref[...]
    qkv3 = qkv.reshape(B, S, QKVP)            # leading-dim split: layout no-op

    # Per-head attention core (static unroll over H=4): 8-lane slices of the
    # fused QKV result, tiny batched matmuls, no broadcasts / no transposes.
    ctx_heads = []
    for h in range(H):
        q_h = qkv3[:, :, 0 * D + h * HD: 0 * D + (h + 1) * HD]    # (B, S, HD)
        k_h = qkv3[:, :, 1 * D + h * HD: 1 * D + (h + 1) * HD]
        v_h = qkv3[:, :, 2 * D + h * HD: 2 * D + (h + 1) * HD]
        s_h = jnp.einsum("bqe,bke->bqk", q_h, k_h,
                         preferred_element_type=jnp.float32)
        p_h = _softmax(s_h)
        ctx_heads.append(jnp.einsum("bqk,bke->bqe", p_h, v_h,
                                    preferred_element_type=jnp.float32))

    # Concatenated contexts -> one (16,32)x(32,128) output-projection matmul.
    ctx = jnp.concatenate(ctx_heads, axis=-1).reshape(BS, D)      # (BS, D)
    attn = jnp.dot(ctx.astype(jnp.bfloat16), wo_ref[...],
                   preferred_element_type=jnp.float32) + bo_ref[...]

    x1 = x + attn                                                  # residual 1

    # ---- MLP sub-block ----------------------------------------------------
    h2 = _layernorm_padded(x1, ln2g_ref[...], ln2b_ref[...])
    ff = jnp.dot(h2.astype(jnp.bfloat16), w1_ref[...],
                 preferred_element_type=jnp.float32) + b1_ref[...]
    ff = _gelu(ff)
    ff = jnp.dot(ff.astype(jnp.bfloat16), w2_ref[...],
                 preferred_element_type=jnp.float32) + b2_ref[...]

    # lane-dense (8,128)-tiled store of the full output slab.
    o_ref[...] = x1 + ff                                           # residual 2


def prep_params(params):
    """One-time host-side layout plumbing (hoisted out of the forward hot path):
    fuse Q/K/V, fold the 1/sqrt(HD) score scale into the Q columns, zero-pad
    everything to lane-dense (multiple-of-128) shapes, cast matmul weights to
    bf16.  Call once and reuse the result across forward calls."""
    (wqkv, bqkv, wo, bo, w1, b1, w2, b2, ln1g, ln1b, ln2g, ln2b) = params
    scale = 1.0 / math.sqrt(HD)

    def pad_last(a, t):
        return jnp.pad(a, [(0, 0)] * (a.ndim - 1) + [(0, t - a.shape[-1])])

    # Fold the score scale into the Q third of the fused QKV weight/bias.
    qscale = jnp.concatenate(
        [jnp.full((D,), scale, jnp.float32), jnp.ones((2 * D,), jnp.float32)])
    wqkv_p = pad_last(jnp.pad(wqkv * qscale[None, :], ((0, DP - D), (0, 0))), QKVP)
    bqkv_p = pad_last(bqkv * qscale[None, :], QKVP)

    return (
        wqkv_p.astype(jnp.bfloat16),                       # (DP, QKVP)
        bqkv_p,                                            # (1, QKVP)
        pad_last(wo, DP).astype(jnp.bfloat16),             # (D, DP)
        pad_last(bo, DP),                                  # (1, DP)
        jnp.pad(w1, ((0, DP - D), (0, FP - F))).astype(jnp.bfloat16),  # (DP, FP)
        pad_last(b1, FP),                                  # (1, FP)
        jnp.pad(w2, ((0, FP - F), (0, DP - D))).astype(jnp.bfloat16),  # (FP, DP)
        pad_last(b2, DP),                                  # (1, DP)
        # gamma/beta pads are ZERO on purpose so pad lanes stay zero after LN.
        pad_last(ln1g, DP), pad_last(ln1b, DP),
        pad_last(ln2g, DP), pad_last(ln2b, DP),
    )


@jax.jit
def transformer_block(x, prepped):
    # Hot path: activation lane-pad + one gridless pallas_call (all operands
    # are tiny and live whole in VMEM via default full-array blocks).
    xp = jnp.pad(x, ((0, 0), (0, 0), (0, DP - D))).reshape(BS, DP)
    out = pl.pallas_call(
        transformer_block_kernel,
        out_shape=jax.ShapeDtypeStruct((BS, DP), jnp.float32),
    )(xp, *prepped)
    return out.reshape(B, S, DP)[..., :D]                 # drop lane padding


def init_params(key):
    ks = jax.random.split(key, 9)
    w = 0.02
    wqkv = w * jax.random.normal(ks[0], (D, 3 * D), jnp.float32)
    bqkv = w * jax.random.normal(ks[1], (1, 3 * D), jnp.float32)
    wo = w * jax.random.normal(ks[2], (D, D), jnp.float32)
    bo = w * jax.random.normal(ks[3], (1, D), jnp.float32)
    w1 = w * jax.random.normal(ks[4], (D, F), jnp.float32)
    b1 = w * jax.random.normal(ks[5], (1, F), jnp.float32)
    w2 = w * jax.random.normal(ks[6], (F, D), jnp.float32)
    b2 = w * jax.random.normal(ks[7], (1, D), jnp.float32)
    ln1g = jnp.ones((1, D), jnp.float32)
    ln1b = w * jax.random.normal(ks[8], (1, D), jnp.float32)
    ln2g = jnp.ones((1, D), jnp.float32)
    ln2b = jnp.zeros((1, D), jnp.float32)
    return (wqkv, bqkv, wo, bo, w1, b1, w2, b2, ln1g, ln1b, ln2g, ln2b)


def reference_block(x, params):
    """Pure-JAX f32 reference with the original (unpadded, per-head-slice) form."""
    (wqkv, bqkv, wo, bo, w1, b1, w2, b2, ln1g, ln1b, ln2g, ln2b) = params

    def ln(t, g, b):
        mu = jnp.mean(t, axis=-1, keepdims=True)
        var = jnp.mean((t - mu) ** 2, axis=-1, keepdims=True)
        return (t - mu) * jax.lax.rsqrt(var + EPS) * g + b

    h = ln(x, ln1g, ln1b)
    qkv = h @ wqkv + bqkv
    q, k, v = jnp.split(qkv, 3, axis=-1)

    def heads(t):
        return t.reshape(B, S, H, HD).transpose(0, 2, 1, 3)   # (B, H, S, HD)

    qh, kh, vh = heads(q), heads(k), heads(v)
    s = jnp.einsum("bhqe,bhke->bhqk", qh, kh) / math.sqrt(HD)
    p = jax.nn.softmax(s, axis=-1)
    ctx = jnp.einsum("bhqk,bhke->bhqe", p, vh)
    attn = ctx.transpose(0, 2, 1, 3).reshape(B, S, D) @ wo + bo
    x1 = x + attn
    h2 = ln(x1, ln2g, ln2b)
    ff = _gelu(h2 @ w1 + b1)
    ff = ff @ w2 + b2
    return x1 + ff


if __name__ == "__main__":
    key = jax.random.PRNGKey(0)
    kx, kp = jax.random.split(key)
    x = jax.random.normal(kx, (B, S, D), jnp.float32)
    params = init_params(kp)

    # One-time weight prep, hoisted out of the per-call path (perf review #1).
    prepped = prep_params(params)

    out = jax.block_until_ready(transformer_block(x, prepped))
    assert out.shape == (B, S, D) and out.dtype == jnp.float32
    assert bool(jnp.all(jnp.isfinite(out)))

    ref = reference_block(x, params)
    err = float(jnp.max(jnp.abs(out - ref)))
    assert err < 5e-3, f"kernel mismatch vs reference: max abs err = {err}"
    print("KERNEL_OK")
</pallas_src>

<mosaic_0001>
module attributes {stable_mosaic.version = 11 : i64} {
  func.func @transformer_block_kernel(%arg0: memref<16x128xf32, #tpu.memory_space<vmem>>, %arg1: memref<128x128xbf16, #tpu.memory_space<vmem>>, %arg2: memref<1x128xf32, #tpu.memory_space<vmem>>, %arg3: memref<32x128xbf16, #tpu.memory_space<vmem>>, %arg4: memref<1x128xf32, #tpu.memory_space<vmem>>, %arg5: memref<128x128xbf16, #tpu.memory_space<vmem>>, %arg6: memref<1x128xf32, #tpu.memory_space<vmem>>, %arg7: memref<128x128xbf16, #tpu.memory_space<vmem>>, %arg8: memref<1x128xf32, #tpu.memory_space<vmem>>, %arg9: memref<1x128xf32, #tpu.memory_space<vmem>>, %arg10: memref<1x128xf32, #tpu.memory_space<vmem>>, %arg11: memref<1x128xf32, #tpu.memory_space<vmem>>, %arg12: memref<1x128xf32, #tpu.memory_space<vmem>>, %arg13: memref<16x128xf32, #tpu.memory_space<vmem>>) attributes {dimension_semantics = [], scalar_prefetch = 0 : i64, scratch_operands = 0 : i64, tpu.core_type = #tpu.core_type<tc>} {
    %c0 = arith.constant 0 : index
    %c0_0 = arith.constant 0 : index
    %0 = vector.load %arg0[%c0, %c0_0] : memref<16x128xf32, #tpu.memory_space<vmem>>, vector<16x128xf32>
    %c0_1 = arith.constant 0 : index
    %c0_2 = arith.constant 0 : index
    %1 = vector.load %arg9[%c0_1, %c0_2] : memref<1x128xf32, #tpu.memory_space<vmem>>, vector<1x128xf32>
    %c0_3 = arith.constant 0 : index
    %c0_4 = arith.constant 0 : index
    %2 = vector.load %arg10[%c0_3, %c0_4] : memref<1x128xf32, #tpu.memory_space<vmem>>, vector<1x128xf32>
    %cst = arith.constant dense<0.000000e+00> : vector<16xf32>
    %3 = vector.multi_reduction <add>, %0, %cst [1] : vector<16x128xf32> to vector<16xf32>
    %4 = vector.shape_cast %3 : vector<16xf32> to vector<16x1xf32>
    %cst_5 = arith.constant 3.125000e-02 : f32
    %5 = vector.broadcast %cst_5 : f32 to vector<16x1xf32>
    %6 = arith.mulf %4, %5 : vector<16x1xf32>
    %7 = arith.mulf %0, %0 : vector<16x128xf32>
    %cst_6 = arith.constant dense<0.000000e+00> : vector<16xf32>
    %8 = vector.multi_reduction <add>, %7, %cst_6 [1] : vector<16x128xf32> to vector<16xf32>
    %9 = vector.shape_cast %8 : vector<16xf32> to vector<16x1xf32>
    %cst_7 = arith.constant 3.125000e-02 : f32
    %10 = vector.broadcast %cst_7 : f32 to vector<16x1xf32>
    %11 = arith.mulf %9, %10 : vector<16x1xf32>
    %12 = arith.mulf %6, %6 : vector<16x1xf32>
    %13 = arith.subf %11, %12 : vector<16x1xf32>
    %cst_8 = arith.constant 0.000000e+00 : f32
    %14 = vector.broadcast %cst_8 : f32 to vector<16x1xf32>
    %15 = arith.maximumf %13, %14 : vector<16x1xf32>
    %16 = vector.broadcast %6 : vector<16x1xf32> to vector<16x128xf32>
    %17 = arith.subf %0, %16 : vector<16x128xf32>
    %cst_9 = arith.constant 9.99999974E-6 : f32
    %18 = vector.broadcast %cst_9 : f32 to vector<16x1xf32>
    %19 = arith.addf %15, %18 : vector<16x1xf32>
    %20 = math.rsqrt %19 : vector<16x1xf32>
    %21 = vector.broadcast %20 : vector<16x1xf32> to vector<16x128xf32>
    %22 = arith.mulf %17, %21 : vector<16x128xf32>
    %23 = vector.broadcast %1 : vector<1x128xf32> to vector<16x128xf32>
    %24 = arith.mulf %22, %23 : vector<16x128xf32>
    %25 = vector.broadcast %2 : vector<1x128xf32> to vector<16x128xf32>
    %26 = arith.addf %24, %25 : vector<16x128xf32>
    %27 = arith.truncf %26 : vector<16x128xf32> to vector<16x128xbf16>
    %c0_10 = arith.constant 0 : index
    %c0_11 = arith.constant 0 : index
    %28 = vector.load %arg1[%c0_10, %c0_11] : memref<128x128xbf16, #tpu.memory_space<vmem>>, vector<128x128xbf16>
    %cst_12 = arith.constant dense<0.000000e+00> : vector<16x128xf32>
    %29 = tpu.matmul %27, %28, %cst_12 {dimension_numbers = #tpu.dot_dimension_numbers<[1], [0], [0], [1], [0, 0, 1, 1], [], []>} : vector<16x128xbf16>, vector<128x128xbf16>, vector<16x128xf32> -> vector<16x128xf32>
    %c0_13 = arith.constant 0 : index
    %c0_14 = arith.constant 0 : index
    %30 = vector.load %arg2[%c0_13, %c0_14] : memref<1x128xf32, #tpu.memory_space<vmem>>, vector<1x128xf32>
    %31 = vector.broadcast %30 : vector<1x128xf32> to vector<16x128xf32>
    %32 = arith.addf %29, %31 : vector<16x128xf32>
    %33 = vector.shape_cast %32 : vector<16x128xf32> to vector<2x8x128xf32>
    %34 = vector.extract_strided_slice %33 {offsets = [0, 0, 0], sizes = [2, 8, 8], strides = [1, 1, 1]} : vector<2x8x128xf32> to vector<2x8x8xf32>
    %35 = vector.extract_strided_slice %33 {offsets = [0, 0, 32], sizes = [2, 8, 8], strides = [1, 1, 1]} : vector<2x8x128xf32> to vector<2x8x8xf32>
    %36 = vector.extract_strided_slice %33 {offsets = [0, 0, 64], sizes = [2, 8, 8], strides = [1, 1, 1]} : vector<2x8x128xf32> to vector<2x8x8xf32>
    "tpu.trace_start"() <{level = 10 : i32, message = "bqe,bke->bqk"}> : () -> ()
    %cst_15 = arith.constant dense<0.000000e+00> : vector<2x8x8xf32>
    %37 = tpu.matmul %34, %35, %cst_15 {dimension_numbers = #tpu.dot_dimension_numbers<[2], [2], [1], [1], [0, 0, 0, 1, 1, 1], [0], [0]>} : vector<2x8x8xf32>, vector<2x8x8xf32>, vector<2x8x8xf32> -> vector<2x8x8xf32>
    "tpu.trace_stop"() : () -> ()
    %cst_16 = arith.constant dense<0xFF800000> : vector<2x8xf32>
    %38 = vector.multi_reduction <maximumf>, %37, %cst_16 [2] : vector<2x8x8xf32> to vector<2x8xf32>
    %39 = vector.shape_cast %38 : vector<2x8xf32> to vector<2x8x1xf32>
    %40 = vector.broadcast %39 : vector<2x8x1xf32> to vector<2x8x8xf32>
    %41 = arith.subf %37, %40 : vector<2x8x8xf32>
    %42 = math.exp %41 : vector<2x8x8xf32>
    %cst_17 = arith.constant dense<0.000000e+00> : vector<2x8xf32>
    %43 = vector.multi_reduction <add>, %42, %cst_17 [2] : vector<2x8x8xf32> to vector<2x8xf32>
    %44 = vector.shape_cast %43 : vector<2x8xf32> to vector<2x8x1xf32>
    %45 = tpu.reciprocal %44 {approx = true} : vector<2x8x1xf32> -> vector<2x8x1xf32>
    %46 = vector.broadcast %45 : vector<2x8x1xf32> to vector<2x8x8xf32>
    %47 = arith.mulf %42, %46 : vector<2x8x8xf32>
    "tpu.trace_start"() <{level = 10 : i32, message = "bqk,bke->bqe"}> : () -> ()
    %cst_18 = arith.constant dense<0.000000e+00> : vector<2x8x8xf32>
    %48 = tpu.matmul %47, %36, %cst_18 {dimension_numbers = #tpu.dot_dimension_numbers<[2], [1], [1], [2], [0, 0, 0, 1, 1, 2], [0], [0]>} : vector<2x8x8xf32>, vector<2x8x8xf32>, vector<2x8x8xf32> -> vector<2x8x8xf32>
    "tpu.trace_stop"() : () -> ()
    %49 = vector.extract_strided_slice %33 {offsets = [0, 0, 8], sizes = [2, 8, 8], strides = [1, 1, 1]} : vector<2x8x128xf32> to vector<2x8x8xf32>
    %50 = vector.extract_strided_slice %33 {offsets = [0, 0, 40], sizes = [2, 8, 8], strides = [1, 1, 1]} : vector<2x8x128xf32> to vector<2x8x8xf32>
    %51 = vector.extract_strided_slice %33 {offsets = [0, 0, 72], sizes = [2, 8, 8], strides = [1, 1, 1]} : vector<2x8x128xf32> to vector<2x8x8xf32>
    "tpu.trace_start"() <{level = 10 : i32, message = "bqe,bke->bqk"}> : () -> ()
    %cst_19 = arith.constant dense<0.000000e+00> : vector<2x8x8xf32>
    %52 = tpu.matmul %49, %50, %cst_19 {dimension_numbers = #tpu.dot_dimension_numbers<[2], [2], [1], [1], [0, 0, 0, 1, 1, 1], [0], [0]>} : vector<2x8x8xf32>, vector<2x8x8xf32>, vector<2x8x8xf32> -> vector<2x8x8xf32>
    "tpu.trace_stop"() : () -> ()
    %cst_20 = arith.constant dense<0xFF800000> : vector<2x8xf32>
    %53 = vector.multi_reduction <maximumf>, %52, %cst_20 [2] : vector<2x8x8xf32> to vector<2x8xf32>
    %54 = vector.shape_cast %53 : vector<2x8xf32> to vector<2x8x1xf32>
    %55 = vector.broadcast %54 : vector<2x8x1xf32> to vector<2x8x8xf32>
    %56 = arith.subf %52, %55 : vector<2x8x8xf32>
    %57 = math.exp %56 : vector<2x8x8xf32>
    %cst_21 = arith.constant dense<0.000000e+00> : vector<2x8xf32>
    %58 = vector.multi_reduction <add>, %57, %cst_21 [2] : vector<2x8x8xf32> to vector<2x8xf32>
    %59 = vector.shape_cast %58 : vector<2x8xf32> to vector<2x8x1xf32>
    %60 = tpu.reciprocal %59 {approx = true} : vector<2x8x1xf32> -> vector<2x8x1xf32>
    %61 = vector.broadcast %60 : vector<2x8x1xf32> to vector<2x8x8xf32>
    %62 = arith.mulf %57, %61 : vector<2x8x8xf32>
    "tpu.trace_start"() <{level = 10 : i32, message = "bqk,bke->bqe"}> : () -> ()
    %cst_22 = arith.constant dense<0.000000e+00> : vector<2x8x8xf32>
    %63 = tpu.matmul %62, %51, %cst_22 {dimension_numbers = #tpu.dot_dimension_numbers<[2], [1], [1], [2], [0, 0, 0, 1, 1, 2], [0], [0]>} : vector<2x8x8xf32>, vector<2x8x8xf32>, vector<2x8x8xf32> -> vector<2x8x8xf32>
    "tpu.trace_stop"() : () -> ()
    %64 = vector.extract_strided_slice %33 {offsets = [0, 0, 16], sizes = [2, 8, 8], strides = [1, 1, 1]} : vector<2x8x128xf32> to vector<2x8x8xf32>
    %65 = vector.extract_strided_slice %33 {offsets = [0, 0, 48], sizes = [2, 8, 8], strides = [1, 1, 1]} : vector<2x8x128xf32> to vector<2x8x8xf32>
    %66 = vector.extract_strided_slice %33 {offsets = [0, 0, 80], sizes = [2, 8, 8], strides = [1, 1, 1]} : vector<2x8x128xf32> to vector<2x8x8xf32>
    "tpu.trace_start"() <{level = 10 : i32, message = "bqe,bke->bqk"}> : () -> ()
    %cst_23 = arith.constant dense<0.000000e+00> : vector<2x8x8xf32>
    %67 = tpu.matmul %64, %65, %cst_23 {dimension_numbers = #tpu.dot_dimension_numbers<[2], [2], [1], [1], [0, 0, 0, 1, 1, 1], [0], [0]>} : vector<2x8x8xf32>, vector<2x8x8xf32>, vector<2x8x8xf32> -> vector<2x8x8xf32>
    "tpu.trace_stop"() : () -> ()
    %cst_24 = arith.constant dense<0xFF800000> : vector<2x8xf32>
    %68 = vector.multi_reduction <maximumf>, %67, %cst_24 [2] : vector<2x8x8xf32> to vector<2x8xf32>
    %69 = vector.shape_cast %68 : vector<2x8xf32> to vector<2x8x1xf32>
    %70 = vector.broadcast %69 : vector<2x8x1xf32> to vector<2x8x8xf32>
    %71 = arith.subf %67, %70 : vector<2x8x8xf32>
    %72 = math.exp %71 : vector<2x8x8xf32>
    %cst_25 = arith.constant dense<0.000000e+00> : vector<2x8xf32>
    %73 = vector.multi_reduction <add>, %72, %cst_25 [2] : vector<2x8x8xf32> to vector<2x8xf32>
    %74 = vector.shape_cast %73 : vector<2x8xf32> to vector<2x8x1xf32>
    %75 = tpu.reciprocal %74 {approx = true} : vector<2x8x1xf32> -> vector<2x8x1xf32>
    %76 = vector.broadcast %75 : vector<2x8x1xf32> to vector<2x8x8xf32>
    %77 = arith.mulf %72, %76 : vector<2x8x8xf32>
    "tpu.trace_start"() <{level = 10 : i32, message = "bqk,bke->bqe"}> : () -> ()
    %cst_26 = arith.constant dense<0.000000e+00> : vector<2x8x8xf32>
    %78 = tpu.matmul %77, %66, %cst_26 {dimension_numbers = #tpu.dot_dimension_numbers<[2], [1], [1], [2], [0, 0, 0, 1, 1, 2], [0], [0]>} : vector<2x8x8xf32>, vector<2x8x8xf32>, vector<2x8x8xf32> -> vector<2x8x8xf32>
    "tpu.trace_stop"() : () -> ()
    %79 = vector.extract_strided_slice %33 {offsets = [0, 0, 24], sizes = [2, 8, 8], strides = [1, 1, 1]} : vector<2x8x128xf32> to vector<2x8x8xf32>
    %80 = vector.extract_strided_slice %33 {offsets = [0, 0, 56], sizes = [2, 8, 8], strides = [1, 1, 1]} : vector<2x8x128xf32> to vector<2x8x8xf32>
    %81 = vector.extract_strided_slice %33 {offsets = [0, 0, 88], sizes = [2, 8, 8], strides = [1, 1, 1]} : vector<2x8x128xf32> to vector<2x8x8xf32>
    "tpu.trace_start"() <{level = 10 : i32, message = "bqe,bke->bqk"}> : () -> ()
    %cst_27 = arith.constant dense<0.000000e+00> : vector<2x8x8xf32>
    %82 = tpu.matmul %79, %80, %cst_27 {dimension_numbers = #tpu.dot_dimension_numbers<[2], [2], [1], [1], [0, 0, 0, 1, 1, 1], [0], [0]>} : vector<2x8x8xf32>, vector<2x8x8xf32>, vector<2x8x8xf32> -> vector<2x8x8xf32>
    "tpu.trace_stop"() : () -> ()
    %cst_28 = arith.constant dense<0xFF800000> : vector<2x8xf32>
    %83 = vector.multi_reduction <maximumf>, %82, %cst_28 [2] : vector<2x8x8xf32> to vector<2x8xf32>
    %84 = vector.shape_cast %83 : vector<2x8xf32> to vector<2x8x1xf32>
    %85 = vector.broadcast %84 : vector<2x8x1xf32> to vector<2x8x8xf32>
    %86 = arith.subf %82, %85 : vector<2x8x8xf32>
    %87 = math.exp %86 : vector<2x8x8xf32>
    %cst_29 = arith.constant dense<0.000000e+00> : vector<2x8xf32>
    %88 = vector.multi_reduction <add>, %87, %cst_29 [2] : vector<2x8x8xf32> to vector<2x8xf32>
    %89 = vector.shape_cast %88 : vector<2x8xf32> to vector<2x8x1xf32>
    %90 = tpu.reciprocal %89 {approx = true} : vector<2x8x1xf32> -> vector<2x8x1xf32>
    %91 = vector.broadcast %90 : vector<2x8x1xf32> to vector<2x8x8xf32>
    %92 = arith.mulf %87, %91 : vector<2x8x8xf32>
    "tpu.trace_start"() <{level = 10 : i32, message = "bqk,bke->bqe"}> : () -> ()
    %cst_30 = arith.constant dense<0.000000e+00> : vector<2x8x8xf32>
    %93 = tpu.matmul %92, %81, %cst_30 {dimension_numbers = #tpu.dot_dimension_numbers<[2], [1], [1], [2], [0, 0, 0, 1, 1, 2], [0], [0]>} : vector<2x8x8xf32>, vector<2x8x8xf32>, vector<2x8x8xf32> -> vector<2x8x8xf32>
    "tpu.trace_stop"() : () -> ()
    %94 = tpu.concatenate %48, %63, %78, %93 in 2 : vector<2x8x8xf32>, vector<2x8x8xf32>, vector<2x8x8xf32>, vector<2x8x8xf32> -> vector<2x8x32xf32>
    %95 = vector.shape_cast %94 : vector<2x8x32xf32> to vector<16x32xf32>
    %96 = arith.truncf %95 : vector<16x32xf32> to vector<16x32xbf16>
    %c0_31 = arith.constant 0 : index
    %c0_32 = arith.constant 0 : index
    %97 = vector.load %arg3[%c0_31, %c0_32] : memref<32x128xbf16, #tpu.memory_space<vmem>>, vector<32x128xbf16>
    %cst_33 = arith.constant dense<0.000000e+00> : vector<16x128xf32>
    %98 = tpu.matmul %96, %97, %cst_33 {dimension_numbers = #tpu.dot_dimension_numbers<[1], [0], [0], [1], [0, 0, 1, 1], [], []>} : vector<16x32xbf16>, vector<32x128xbf16>, vector<16x128xf32> -> vector<16x128xf32>
    %c0_34 = arith.constant 0 : index
    %c0_35 = arith.constant 0 : index
    %99 = vector.load %arg4[%c0_34, %c0_35] : memref<1x128xf32, #tpu.memory_space<vmem>>, vector<1x128xf32>
    %100 = vector.broadcast %99 : vector<1x128xf32> to vector<16x128xf32>
    %101 = arith.addf %98, %100 : vector<16x128xf32>
    %102 = arith.addf %0, %101 : vector<16x128xf32>
    %c0_36 = arith.constant 0 : index
    %c0_37 = arith.constant 0 : index
    %103 = vector.load %arg11[%c0_36, %c0_37] : memref<1x128xf32, #tpu.memory_space<vmem>>, vector<1x128xf32>
    %c0_38 = arith.constant 0 : index
    %c0_39 = arith.constant 0 : index
    %104 = vector.load %arg12[%c0_38, %c0_39] : memref<1x128xf32, #tpu.memory_space<vmem>>, vector<1x128xf32>
    %cst_40 = arith.constant dense<0.000000e+00> : vector<16xf32>
    %105 = vector.multi_reduction <add>, %102, %cst_40 [1] : vector<16x128xf32> to vector<16xf32>
    %106 = vector.shape_cast %105 : vector<16xf32> to vector<16x1xf32>
    %cst_41 = arith.constant 3.125000e-02 : f32
    %107 = vector.broadcast %cst_41 : f32 to vector<16x1xf32>
    %108 = arith.mulf %106, %107 : vector<16x1xf32>
    %109 = arith.mulf %102, %102 : vector<16x128xf32>
    %cst_42 = arith.constant dense<0.000000e+00> : vector<16xf32>
    %110 = vector.multi_reduction <add>, %109, %cst_42 [1] : vector<16x128xf32> to vector<16xf32>
    %111 = vector.shape_cast %110 : vector<16xf32> to vector<16x1xf32>
    %cst_43 = arith.constant 3.125000e-02 : f32
    %112 = vector.broadcast %cst_43 : f32 to vector<16x1xf32>
    %113 = arith.mulf %111, %112 : vector<16x1xf32>
    %114 = arith.mulf %108, %108 : vector<16x1xf32>
    %115 = arith.subf %113, %114 : vector<16x1xf32>
    %cst_44 = arith.constant 0.000000e+00 : f32
    %116 = vector.broadcast %cst_44 : f32 to vector<16x1xf32>
    %117 = arith.maximumf %115, %116 : vector<16x1xf32>
    %118 = vector.broadcast %108 : vector<16x1xf32> to vector<16x128xf32>
    %119 = arith.subf %102, %118 : vector<16x128xf32>
    %cst_45 = arith.constant 9.99999974E-6 : f32
    %120 = vector.broadcast %cst_45 : f32 to vector<16x1xf32>
    %121 = arith.addf %117, %120 : vector<16x1xf32>
    %122 = math.rsqrt %121 : vector<16x1xf32>
    %123 = vector.broadcast %122 : vector<16x1xf32> to vector<16x128xf32>
    %124 = arith.mulf %119, %123 : vector<16x128xf32>
    %125 = vector.broadcast %103 : vector<1x128xf32> to vector<16x128xf32>
    %126 = arith.mulf %124, %125 : vector<16x128xf32>
    %127 = vector.broadcast %104 : vector<1x128xf32> to vector<16x128xf32>
    %128 = arith.addf %126, %127 : vector<16x128xf32>
    %129 = arith.truncf %128 : vector<16x128xf32> to vector<16x128xbf16>
    %c0_46 = arith.constant 0 : index
    %c0_47 = arith.constant 0 : index
    %130 = vector.load %arg5[%c0_46, %c0_47] : memref<128x128xbf16, #tpu.memory_space<vmem>>, vector<128x128xbf16>
    %cst_48 = arith.constant dense<0.000000e+00> : vector<16x128xf32>
    %131 = tpu.matmul %129, %130, %cst_48 {dimension_numbers = #tpu.dot_dimension_numbers<[1], [0], [0], [1], [0, 0, 1, 1], [], []>} : vector<16x128xbf16>, vector<128x128xbf16>, vector<16x128xf32> -> vector<16x128xf32>
    %c0_49 = arith.constant 0 : index
    %c0_50 = arith.constant 0 : index
    %132 = vector.load %arg6[%c0_49, %c0_50] : memref<1x128xf32, #tpu.memory_space<vmem>>, vector<1x128xf32>
    %133 = vector.broadcast %132 : vector<1x128xf32> to vector<16x128xf32>
    %134 = arith.addf %131, %133 : vector<16x128xf32>
    %cst_51 = arith.constant 5.000000e-01 : f32
    %135 = vector.broadcast %cst_51 : f32 to vector<16x128xf32>
    %136 = arith.mulf %135, %134 : vector<16x128xf32>
    %cst_52 = arith.constant 4.471500e-02 : f32
    %137 = vector.broadcast %cst_52 : f32 to vector<16x128xf32>
    %138 = arith.mulf %137, %134 : vector<16x128xf32>
    %139 = arith.mulf %138, %134 : vector<16x128xf32>
    %140 = arith.mulf %139, %134 : vector<16x128xf32>
    %141 = arith.addf %134, %140 : vector<16x128xf32>
    %cst_53 = arith.constant 0.797884583 : f32
    %142 = vector.broadcast %cst_53 : f32 to vector<16x128xf32>
    %143 = arith.mulf %142, %141 : vector<16x128xf32>
    %144 = math.tanh %143 : vector<16x128xf32>
    %cst_54 = arith.constant 1.000000e+00 : f32
    %145 = vector.broadcast %cst_54 : f32 to vector<16x128xf32>
    %146 = arith.addf %145, %144 : vector<16x128xf32>
    %147 = arith.mulf %136, %146 : vector<16x128xf32>
    %148 = arith.truncf %147 : vector<16x128xf32> to vector<16x128xbf16>
    %c0_55 = arith.constant 0 : index
    %c0_56 = arith.constant 0 : index
    %149 = vector.load %arg7[%c0_55, %c0_56] : memref<128x128xbf16, #tpu.memory_space<vmem>>, vector<128x128xbf16>
    %cst_57 = arith.constant dense<0.000000e+00> : vector<16x128xf32>
    %150 = tpu.matmul %148, %149, %cst_57 {dimension_numbers = #tpu.dot_dimension_numbers<[1], [0], [0], [1], [0, 0, 1, 1], [], []>} : vector<16x128xbf16>, vector<128x128xbf16>, vector<16x128xf32> -> vector<16x128xf32>
    %c0_58 = arith.constant 0 : index
    %c0_59 = arith.constant 0 : index
    %151 = vector.load %arg8[%c0_58, %c0_59] : memref<1x128xf32, #tpu.memory_space<vmem>>, vector<1x128xf32>
    %152 = vector.broadcast %151 : vector<1x128xf32> to vector<16x128xf32>
    %153 = arith.addf %150, %152 : vector<16x128xf32>
    %154 = arith.addf %102, %153 : vector<16x128xf32>
    %c0_60 = arith.constant 0 : index
    %c0_61 = arith.constant 0 : index
    %155 = vector.load %arg13[%c0_60, %c0_61] : memref<16x128xf32, #tpu.memory_space<vmem>>, vector<16x128xf32>
    tpu.vector_store %arg13[%c0_60, %c0_61], %154 {strides = array<i32>} : memref<16x128xf32, #tpu.memory_space<vmem>>, vector<16x128xf32>,
    return
  }
}

</mosaic_0001>

<bundles_post_ra>
// kernel: transformer_block.1
= control target key start
LH: loop header
LB: loop body
LE: loop exit
PB: predicated region body
PF: predicated region fallthrough
CT: control target
= control target key end

     0   :  { %18 = vsyncpa [#allocation3], 0  ;;  %s1711_s0 = inlined_call_operand.vmem [shape: f32[16,128], index: 0, kind: input, shape index: {}]   ;;  %s1712_s1 = inlined_call_operand.hbm [shape: bf16[128,128], index: 1, kind: input, shape index: {}]   ;;  %s1713_s2 = inlined_call_operand.vmem [shape: f32[1,128], index: 2, kind: input, shape index: {}]   ;;  %s1714_s3 = inlined_call_operand.vmem [shape: bf16[32,128], index: 3, kind: input, shape index: {}]   ;;  %s1715_s4 = inlined_call_operand.vmem [shape: f32[1,128], index: 4, kind: input, shape index: {}]   ;;  %s1716_s5 = inlined_call_operand.hbm [shape: bf16[128,128], index: 5, kind: input, shape index: {}]   ;;  %s1717_s6 = inlined_call_operand.vmem [shape: f32[1,128], index: 6, kind: input, shape index: {}]   ;;  %s1718_s7 = inlined_call_operand.hbm [shape: bf16[128,128], index: 7, kind: input, shape index: {}]   ;;  %s1719_s8 = inlined_call_operand.vmem [shape: f32[1,128], index: 8, kind: input, shape index: {}]   ;;  %s1720_s9 = inlined_call_operand.vmem [shape: f32[1,128], index: 9, kind: input, shape index: {}]   ;;  %s1721_s10 = inlined_call_operand.vmem [shape: f32[1,128], index: 10, kind: input, shape index: {}]   ;;  %s1722_s11 = inlined_call_operand.vmem [shape: f32[1,128], index: 11, kind: input, shape index: {}]   ;;  %s1723_s12 = inlined_call_operand.vmem [shape: f32[1,128], index: 12, kind: input, shape index: {}]   ;;  %s1724_s13 = inlined_call_operand.hbm [shape: f32[16,128], index: 13, kind: output, shape index: {}]  }
   0x1   :  { %19 = vsyncpa [#allocation6], 0 }
   0x2   :  { %20 = vsyncpa [#allocation4], 0  ;;  %s46_s27 = sshll.u32 %s1716_s5, 4  ;;  %s1453_s28 = smov [#allocation5]   ;;  %s47_s27 = int_to_ptr.hbm [resolvable:$true] %s46_s27 }
   0x3   :  { %s48_s29 = sshll.u32 %s1453_s28, 4  ;;  %s27_s15 = sshll.u32 %s1712_s1, 4  ;;  %s49_s29 = int_to_ptr.vmem [resolvable:$true] %s48_s29  ;;  %s28_s15 = int_to_ptr.hbm [resolvable:$true] %s27_s15 }
   0x4   :  { %s1454_s16 = smov 64   ;;  %s1455_s17 = smov 4  }
   0x5   :  { %54 = dma.hbm_to_vmem [thread:$0]  %s47_s27, 1024, %s49_s29, [#allocation6], %s1454_s16, %s1454_s16, %s1455_s17  }
   0x6   :  { %s1456_s18 = smov [#allocation2]   ;;  %s61_s5 = sshll.u32 %s1718_s7, 4  ;;  %s62_s5 = int_to_ptr.hbm [resolvable:$true] %s61_s5 }
   0x7   :  { %s29_s19 = sshll.u32 %s1456_s18, 4  ;;  %s1457_s22 = smov [#allocation7]   ;;  %s30_s19 = int_to_ptr.vmem [resolvable:$true] %s29_s19 }
   0x8   :  { %35 = dma.hbm_to_vmem [thread:$0]  %s28_s15, 1024, %s30_s19, [#allocation3], %s1454_s16, %s1454_s16, %s1455_s17  }
   0x9   :  { %s63_s23 = sshll.u32 %s1457_s22, 4  ;;  %s64_s23 = int_to_ptr.vmem [resolvable:$true] %s63_s23 }
   0xa   :  { %69 = dma.hbm_to_vmem [thread:$0]  %s62_s5, 1024, %s64_s23, [#allocation6], %s1454_s16, %s1454_s16, %s1455_s17  }
   0xb   :  { %1447 = dma.done.wait [#allocation3], 1024  }
   0xc   :  { %1448 = vsyncadd [#allocation3], 4294966272 }
   0xd   :  { %1449 = dma.done.wait [#allocation6], 2048  }
   0xe   :  { %1450 = vsyncadd [#allocation6], 4294965248  ;;  %v1561_v0 = vld [vmem:[%s1711_s0] sm:$0xff]  ;;  %v1569_v2 = vld [vmem:[%s1711_s0 + $0x8] sm:$0xff]  ;;  %s1459_s14 = smov 96   ;;  %s1462_s15 = smov 80  }
   0xf   :  { %97 = vadd.xlane.f32.xlu0 %v1561_v0  ;;  %v103_v1 = vmul.f32 %v1561_v0, %v1561_v0  ;;  %v104_v3 = vmul.f32 %v1569_v2, %v1569_v2  ;;  %v1230_v4 = vld [vmem:[#allocation2 + $0x38] sm:$0xff]  ;;  %v1229_v5 = vld [vmem:[#allocation2 + $0x30] sm:$0xff]  ;;  %v1228_v6 = vld [vmem:[#allocation2 + $0x28] sm:$0xff]  ;;  %vm239_vm6 = vcmask 64512   ;;  %s1463_s17 = smov 56   ;;  %s1464_s18 = smov 48  }
  0x10   :  { %222 = vmatpush.bf16.msra.mxu0 %v1230_v4  ;;  %v1227_v7 = vld [vmem:[#allocation2 + $0x20] sm:$0xff]  ;;  %v1226_v8 = vld [vmem:[#allocation2 + $0x18] sm:$0xff]  ;;  %v1225_v11 = vld [vmem:[#allocation2 + $0x10] sm:$0xff]  ;;  %s1465_s19 = smov 72   ;;  %s1467_s20 = smov 40   ;;  %vm781_vm7 = vcmask 130048  }
  0x11   :  { %105 = vadd.xlane.f32.xlu1 %v103_v1  ;;  %v1224_v15 = vld [vmem:[#allocation2 + $0x8] sm:$0xff]  ;;  %v1223_v18 = vld [vmem:[#allocation2] sm:$0xff]  ;;  %s1468_s21 = smov 8   ;;  %s1469_s5 = smov 16   ;;  %vm784_vm8 = vcmask 195584   ;;  %vm808_vm9 = vcmask 261120  }
  0x12   :  { %v1299_v42 = vld [vmem:[%s1720_s9] ss:$0 sm:$0xff]  ;;  %s1458_s9 = smov 88   ;;  %s1470_s22 = smov 24  }
  0x13   :  { %v1300_v48 = vld [vmem:[%s1721_s10] ss:$0 sm:$0xff]  ;;  %s1460_s10 = smov 112   ;;  %s1471_s29 = smov [#allocation8]  }
  0x14   :  { %223 = vmatpush.bf16.msra.mxu0 %v1229_v5  ;;  %v1301_v53 = vld [vmem:[%s1713_s2] ss:$0 sm:$0xff]  ;;  %s1461_s2 = smov 120   ;;  %s1078_s30 = sshll.u32 %s1471_s29, 4  ;;  %s1079_s30 = int_to_ptr.vmem [resolvable:$true] %s1078_s30 }
  0x17   :  { %99 = vadd.xlane.f32.xlu0 %v1569_v2 }
  0x18   :  { %224 = vmatpush.bf16.msra.mxu0 %v1228_v6 }
  0x19   :  { %107 = vadd.xlane.f32.xlu1 %v104_v3 }
  0x1c   :  { %225 = vmatpush.bf16.msra.mxu0 %v1227_v7 }
  0x20   :  { %226 = vmatpush.bf16.msra.mxu0 %v1226_v8 }
  0x24   :  { %227 = vmatpush.bf16.msra.mxu0 %v1225_v11 }
  0x28   :  { %228 = vmatpush.bf16.msra.mxu0 %v1224_v15 }
  0x2c   :  { %229 = vmatpush.bf16.msra.mxu0 %v1223_v18 }
  0x82   :  { %v98_v9 = vpop.xlane.xlu0 %97 }
  0x83   :  { %v101_v10 = vmul.f32 0.03125, %v98_v9 }
  0x84   :  { %v106_v12 = vpop.xlane.xlu1 %105 }
  0x85   :  { %v111_v13 = vmul.f32 %v101_v10, %v101_v10  ;;  %v109_v14 = vmul.f32 0.03125, %v106_v12  ;;  %v117_v39 = vsub.f32 %v1561_v0, %v101_v10 }
  0x87   :  { %v113_v16 = vsub.f32 %v109_v14, %v111_v13 }
  0x89   :  { %v115_v17 = vmax.f32 %v113_v16, 0.0 }
  0x8a   :  { %v100_v19 = vpop.xlane.xlu0 %99 }
  0x8b   :  { %v119_v20 = vadd.f32 1e-05, %v115_v17  ;;  %v102_v21 = vmul.f32 0.03125, %v100_v19 }
  0x8c   :  { %v108_v22 = vpop.xlane.xlu1 %107 }
  0x8d   :  { %1307 = vrsqrt.f32 %v119_v20  ;;  %v112_v23 = vmul.f32 %v102_v21, %v102_v21  ;;  %v110_v24 = vmul.f32 0.03125, %v108_v22  ;;  %vm127_vm1 = vweird.f32 %v119_v20 }
  0x8e   :  { %v118_v44 = vsub.f32 %v1569_v2, %v102_v21 }
  0x8f   :  { %v114_v25 = vsub.f32 %v110_v24, %v112_v23 }
  0x91   :  { %v116_v26 = vmax.f32 %v114_v25, 0.0 }
  0x93   :  { %v1308_v27 = vpop.eup %1307  ;;  %v120_v29 = vadd.f32 1e-05, %v116_v26 }
  0x94   :  { %v122_v28 = vmul.f32 %v1308_v27, %v119_v20  ;;  %vm128_vm0 = vweird.f32 %v1308_v27 }
  0x95   :  { %1309 = vrsqrt.f32 %v120_v29  ;;  %vm129_vm2 = vmor %vm127_vm1, %vm128_vm0  ;;  %vm137_vm4 = vweird.f32 %v120_v29 }
  0x96   :  { %v123_v30 = vmul.f32 %v1308_v27, %v122_v28 }
  0x98   :  { %v124_v31 = vmul.f32 0.5, %v123_v30 }
  0x9a   :  { %v125_v32 = vsub.f32 1.5, %v124_v31 }
  0x9b   :  { %v1310_v33 = vpop.eup %1309 }
  0x9c   :  { %v132_v34 = vmul.f32 %v1310_v33, %v120_v29  ;;  %v126_v35 = vmul.f32 %v1308_v27, %v125_v32  ;;  %vm138_vm3 = vweird.f32 %v1310_v33 }
  0x9d   :  { %vm139_vm5 = vmor %vm137_vm4, %vm138_vm3 }
  0x9e   :  { %v133_v36 = vmul.f32 %v1310_v33, %v132_v34  ;;  %v130_v38 = vsel %vm129_vm2, %v1308_v27, %v126_v35 }
  0x9f   :  { %v141_v41 = vmul.f32 %v130_v38, %v117_v39 }
  0xa0   :  { %v134_v37 = vmul.f32 0.5, %v133_v36 }
  0xa1   :  { %v146_v47 = vmul.f32 %v1299_v42, %v141_v41 }
  0xa2   :  { %v135_v40 = vsub.f32 1.5, %v134_v37 }
  0xa3   :  { %v151_v50 = vadd.f32 %v1300_v48, %v146_v47 }
  0xa4   :  { %v136_v43 = vmul.f32 %v1310_v33, %v135_v40 }
  0xa6   :  { %v140_v45 = vsel %vm139_vm5, %v1310_v33, %v136_v43 }
  0xa7   :  { %v142_v46 = vmul.f32 %v140_v45, %v118_v44 }
  0xa9   :  { %v147_v49 = vmul.f32 %v1299_v42, %v142_v46 }
  0xab   :  { %v152_v51 = vadd.f32 %v1300_v48, %v147_v49 }
  0xad   :  { %v153_v52 = vpack.c.bf16 %v152_v51, %v151_v50 }
  0xaf   :  { %230 = vmatmul.bf16.vlgmr.msra.gmra.mxu0 %v153_v52 }
 0x12c   :  { %v231_v54 = vpop.f32.mrf.mxu0 }
 0x12d   :  { %v1585_v55 = vadd.f32 %v1301_v53, %v231_v54 }
 0x12f   :  { %367 = vrot.lane.b32.xlu0 %v1585_v55, %s1458_s9  ;;  %237 = vrot.lane.b32.xlu2 %v1585_v55, %s1459_s14 }
 0x134   :  { %v233_v56 = vpop.f32.mrf.mxu0 }
 0x135   :  { %v1589_v57 = vadd.f32 %v1301_v53, %v233_v56 }
 0x137   :  { %395 = vrot.lane.b32.xlu1 %v1589_v57, %s1458_s9  ;;  %495 = vrot.lane.b32.xlu0 %v1585_v55, %s1460_s10  ;;  %v1617_v12 = vpack.i.bf16 %v1589_v57, %v1585_v55 }
 0x138   :  { %265 = vrot.lane.b32.xlu2 %v1589_v57, %s1459_s14 }
 0x140   :  { %365 = vrot.lane.b32.xlu2 %v1585_v55, %s1461_s2 }
 0x148   :  { %393 = vrot.lane.b32.xlu2 %v1589_v57, %s1461_s2  ;;  %s1472_s2 = smov 128  }
 0x150   :  { %497 = vrot.lane.b32.xlu2 %v1585_v55, %s1462_s15 }
 0x189   :  { %v238_v58 = vpop.permute.xlu2 %237 }
 0x18a   :  { %1126 = vmatpush.xpose.msk.msra.mxu1 %vm239_vm6, %v238_v58 }
 0x18d   :  { %1127 = vmatmul.msk.f32.vlgmr.msra.gmra.mxu1 %vm239_vm6, %v1585_v55 }
 0x192   :  { %v266_v59 = vpop.permute.xlu2 %265 }
 0x193   :  { %1128 = vmatpush.xpose.msk.msra.mxu3 %vm239_vm6, %v266_v59 }
 0x196   :  { %1129 = vmatmul.msk.f32.vlgmr.msra.gmra.mxu3 %vm239_vm6, %v1589_v57 }
 0x19a   :  { %v366_v60 = vpop.permute.xlu2 %365 }
 0x1a1   :  { %v368_v61 = vpop.permute.xlu0 %367 }
 0x1a2   :  { %v394_v62 = vpop.permute.xlu2 %393  ;;  %1132 = vmatpush.xpose.msk.msrb.mxu1 %vm239_vm6, %v368_v61 }
 0x1a5   :  { %1133 = vmatmul.msk.f32.vlgmr.msrb.gmra.mxu1 %vm239_vm6, %v366_v60 }
 0x1a9   :  { %v396_v63 = vpop.permute.xlu1 %395  ;;  %v496_v3 = vpop.permute.xlu0 %495 }
 0x1aa   :  { %v498_v1 = vpop.permute.xlu2 %497  ;;  %1134 = vmatpush.xpose.msk.msra.mxu2 %vm239_vm6, %v396_v63 }
 0x1ad   :  { %1135 = vmatmul.msk.f32.vlgmr.msra.gmra.mxu2 %vm239_vm6, %v394_v62 }
 0x1ae   :  { %1138 = vmatpush.xpose.msk.msrb.mxu2 %vm239_vm6, %v498_v1 }
 0x1b5   :  { %1139 = vmatmul.msk.f32.vlgmr.msrb.gmra.mxu2 %vm239_vm6, %v496_v3 }
 0x20a   :  { %v261_v4 = vpop.f32.mrf.mxu1 }
 0x20b   :  { %v291_v5 = vsel %vm239_vm6, %v261_v4, -inf }
 0x20c   :  { %292 = vmax.xlane.f32.xlu2 %v291_v5 }
 0x219   :  { %v288_v6 = vpop.f32.mrf.mxu3 }
 0x21a   :  { %v294_v7 = vsel %vm239_vm6, %v288_v6, -inf }
 0x21b   :  { %295 = vmax.xlane.f32.xlu1 %v294_v7 }
 0x222   :  { %v390_v8 = vpop.f32.mrf.mxu1 }
 0x223   :  { %v421_v9 = vsel %vm239_vm6, %v390_v8, -inf }
 0x224   :  { %422 = vmax.xlane.f32.xlu0 %v421_v9 }
 0x230   :  { %v418_v10 = vpop.f32.mrf.mxu2 }
 0x231   :  { %v424_v11 = vsel %vm239_vm6, %v418_v10, -inf }
 0x232   :  { %425 = vmax.xlane.f32.xlu2 %v424_v11 }
 0x238   :  { %1275 = vrot.lane.b32.xlu0 %v1617_v12, %s1463_s17  ;;  %v520_v13 = vpop.f32.mrf.mxu2 }
 0x239   :  { %v551_v14 = vsel %vm239_vm6, %v520_v13, -inf }
 0x23a   :  { %552 = vmax.xlane.f32.xlu1 %v551_v14 }
 0x240   :  { %573 = vrot.lane.b32.xlu0 %v1585_v55, %s1464_s18 }
 0x24a   :  { %525 = vrot.lane.b32.xlu2 %v1589_v57, %s1462_s15 }
 0x253   :  { %1270 = vrot.lane.b32.xlu1 %v1617_v12, %s1454_s16  ;;  %s1466_s16 = smov 104  }
 0x25b   :  { %523 = vrot.lane.b32.xlu1 %v1589_v57, %s1460_s10  ;;  %s1080_s10 = sshll.u32 %s1724_s13, 4  ;;  %s1081_s10 = int_to_ptr.hbm [resolvable:$true] %s1080_s10 }
 0x263   :  { %627 = vrot.lane.b32.xlu1 %v1585_v55, %s1465_s19 }
 0x26b   :  { %655 = vrot.lane.b32.xlu1 %v1589_v57, %s1465_s19 }
 0x27f   :  { %v293_v15 = vpop.xlane.xlu2 %292 }
 0x280   :  { %v297_v16 = vsub.f32 %v261_v4, %v293_v15 }
 0x282   :  { %v299_v17 = vmul.f32 1.442695, %v297_v16 }
 0x284   :  { %1311 = vpow2.f32 %v299_v17 }
 0x28a   :  { %v1312_v18 = vpop.eup %1311 }
 0x28b   :  { %v303_v19 = vsel %vm239_vm6, %v1312_v18, 0.0 }
 0x28c   :  { %304 = vadd.xlane.f32.xlu0 %v303_v19 }
 0x28e   :  { %v296_v20 = vpop.xlane.xlu1 %295 }
 0x28f   :  { %v298_v21 = vsub.f32 %v288_v6, %v296_v20 }
 0x291   :  { %v301_v22 = vmul.f32 1.442695, %v298_v21 }
 0x293   :  { %1313 = vpow2.f32 %v301_v22 }
 0x297   :  { %v423_v23 = vpop.xlane.xlu0 %422 }
 0x298   :  { %v427_v24 = vsub.f32 %v390_v8, %v423_v23 }
 0x299   :  { %v1314_v25 = vpop.eup %1313 }
 0x29a   :  { %v429_v26 = vmul.f32 1.442695, %v427_v24  ;;  %v306_v27 = vsel %vm239_vm6, %v1314_v25, 0.0 }
 0x29b   :  { %307 = vadd.xlane.f32.xlu2 %v306_v27 }
 0x29c   :  { %1315 = vpow2.f32 %v429_v26 }
 0x2a2   :  { %v1316_v28 = vpop.eup %1315 }
 0x2a3   :  { %v433_v29 = vsel %vm239_vm6, %v1316_v28, 0.0 }
 0x2a4   :  { %434 = vadd.xlane.f32.xlu0 %v433_v29 }
 0x2a5   :  { %v426_v30 = vpop.xlane.xlu2 %425 }
 0x2a6   :  { %v428_v31 = vsub.f32 %v418_v10, %v426_v30 }
 0x2a8   :  { %v431_v32 = vmul.f32 1.442695, %v428_v31 }
 0x2aa   :  { %1317 = vpow2.f32 %v431_v32  ;;  %v1276_v33 = vpop.permute.xlu0 %1275 }
 0x2ab   :  { %v1278_v34 = vunpack.i.h.bf16 %v1276_v33  ;;  %v1277_v50 = vunpack.i.l.bf16 %v1276_v33 }
 0x2ad   :  { %490 = vmatpush.msra.mxu1 %v1278_v34  ;;  %v553_v35 = vpop.xlane.xlu1 %552  ;;  %v526_v48 = vpop.permute.xlu2 %525 }
 0x2ae   :  { %v557_v36 = vsub.f32 %v520_v13, %v553_v35 }
 0x2b0   :  { %v1318_v37 = vpop.eup %1317  ;;  %v559_v38 = vmul.f32 1.442695, %v557_v36 }
 0x2b1   :  { %v436_v39 = vsel %vm239_vm6, %v1318_v37, 0.0 }
 0x2b2   :  { %1319 = vpow2.f32 %v559_v38  ;;  %v574_v40 = vpop.permute.xlu0 %573  ;;  %437 = vadd.xlane.f32.xlu2 %v436_v39 }
 0x2b3   :  { %594 = vmatpush.msrb.mxu1 %v574_v40 }
 0x2b8   :  { %v1320_v41 = vpop.eup %1319  ;;  %625 = vrot.lane.b32.xlu0 %v1585_v55, %s1466_s16 }
 0x2b9   :  { %v563_v42 = vsel %vm239_vm6, %v1320_v41, 0.0 }
 0x2ba   :  { %564 = vadd.xlane.f32.xlu2 %v563_v42 }
 0x2c5   :  { %v1271_v43 = vpop.permute.xlu1 %1270 }
 0x2c6   :  { %v1273_v44 = vunpack.i.h.bf16 %v1271_v43  ;;  %v1272_v45 = vunpack.i.l.bf16 %v1271_v43 }
 0x2c8   :  { %334 = vmatpush.msrb.mxu3 %v1272_v45 }
 0x2ca   :  { %360 = vmatpush.msra.mxu3 %v1273_v44 }
 0x2cd   :  { %v524_v54 = vpop.permute.xlu1 %523 }
 0x2d2   :  { %653 = vrot.lane.b32.xlu2 %v1589_v57, %s1466_s16 }
 0x2d5   :  { %v628_v59 = vpop.permute.xlu1 %627 }
 0x2dd   :  { %v656_v1 = vpop.permute.xlu1 %655 }
 0x2ff   :  { %v305_v46 = vpop.xlane.xlu0 %304 }
 0x300   :  { %1321 = vrcp.f32 %v305_v46 }
 0x306   :  { %v1322_v47 = vpop.eup %1321 }
 0x307   :  { %v311_v49 = vmul.f32 %v1322_v47, %v1312_v18 }
 0x309   :  { %1130 = vmatmul.msk.f32.vlgmr.msrb.gmra.mxu3 %vm239_vm6, %v311_v49 }
 0x30a   :  { %464 = vmatpush.msrb.mxu3 %v1277_v50 }
 0x30e   :  { %v308_v51 = vpop.xlane.xlu2 %307 }
 0x30f   :  { %1323 = vrcp.f32 %v308_v51  ;;  %v1232_v51 = vld [vmem:[%s1714_s3 + $0x8] sm:$0xff] }
 0x315   :  { %v1324_v52 = vpop.eup %1323 }
 0x316   :  { %v312_v53 = vmul.f32 %v1324_v52, %v1314_v25  ;;  %v1231_v52 = vld [vmem:[%s1714_s3] sm:$0xff] }
 0x317   :  { %v435_v55 = vpop.xlane.xlu0 %434 }
 0x318   :  { %1325 = vrcp.f32 %v435_v55  ;;  %1131 = vmatmul.msk.f32.vlgmr.msra.gmra.mxu3 %vm239_vm6, %v312_v53 }
 0x319   :  { %1140 = vmatpush.xpose.msk.msra.mxu3 %vm239_vm6, %v526_v48 }
 0x31e   :  { %v1326_v56 = vpop.eup %1325 }
 0x31f   :  { %v441_v58 = vmul.f32 %v1326_v56, %v1316_v28 }
 0x321   :  { %1136 = vmatmul.msk.f32.vlgmr.msrb.gmra.mxu3 %vm239_vm6, %v441_v58 }
 0x322   :  { %1144 = vmatpush.xpose.msk.msrb.mxu3 %vm239_vm6, %v628_v59 }
 0x325   :  { %v438_v60 = vpop.xlane.xlu2 %437 }
 0x326   :  { %1327 = vrcp.f32 %v438_v60 }
 0x329   :  { %1141 = vmatmul.msk.f32.vlgmr.msra.gmra.mxu3 %vm239_vm6, %v524_v54 }
 0x32a   :  { %v626_v3 = vpop.permute.xlu0 %625 }
 0x32c   :  { %v1328_v61 = vpop.eup %1327 }
 0x32d   :  { %v442_v62 = vmul.f32 %v1328_v61, %v1318_v37  ;;  %v565_v63 = vpop.xlane.xlu2 %564 }
 0x32e   :  { %1329 = vrcp.f32 %v565_v63 }
 0x32f   :  { %1137 = vmatmul.msk.f32.vlgmr.msra.gmra.mxu1 %vm239_vm6, %v442_v62 }
 0x330   :  { %1146 = vmatpush.xpose.msk.msra.mxu1 %vm239_vm6, %v656_v1 }
 0x331   :  { %1145 = vmatmul.msk.f32.vlgmr.msrb.gmra.mxu3 %vm239_vm6, %v626_v3 }
 0x334   :  { %v1330_v4 = vpop.eup %1329 }
 0x335   :  { %v571_v5 = vmul.f32 %v1330_v4, %v1320_v41  ;;  %v654_v6 = vpop.permute.xlu2 %653 }
 0x337   :  { %1142 = vmatmul.msk.f32.vlgmr.msrb.gmra.mxu1 %vm239_vm6, %v571_v5 }
 0x338   :  { %818 = vmatpush.bf16.msrb.mxu1 %v1232_v51 }
 0x33c   :  { %819 = vmatpush.bf16.msrb.mxu1 %v1231_v52  ;;  %v1303_v52 = vld [vmem:[%s1722_s11] ss:$0 sm:$0xff] }
 0x33f   :  { %1147 = vmatmul.msk.f32.vlgmr.msra.gmra.mxu1 %vm239_vm6, %v654_v6 }
 0x38c   :  { %v1649_v7 = vpop.f32.mrf.mxu3 }
 0x39b   :  { %v1651_v8 = vpop.f32.mrf.mxu3 }
 0x3a4   :  { %v466_v9 = vpop.f32.mrf.mxu3 }
 0x3ac   :  { %v492_v10 = vpop.f32.mrf.mxu1  ;;  %v548_v11 = vpop.f32.mrf.mxu3 }
 0x3ad   :  { %v1284_v13 = vpack.i.bf16 %v492_v10, %v466_v9  ;;  %v554_v14 = vsel %vm239_vm6, %v548_v11, -inf  ;;  %v1302_v10 = vld [vmem:[%s1715_s4] ss:$0 sm:$0xff] }
 0x3ae   :  { %555 = vmax.xlane.f32.xlu0 %v554_v14 }
 0x3b4   :  { %v596_v15 = vpop.f32.mrf.mxu1  ;;  %v650_v16 = vpop.f32.mrf.mxu3 }
 0x3b5   :  { %v681_v17 = vsel %vm239_vm6, %v650_v16, -inf }
 0x3b6   :  { %682 = vmax.xlane.f32.xlu1 %v681_v17 }
 0x3bc   :  { %v678_v18 = vpop.f32.mrf.mxu1 }
 0x3bd   :  { %v684_v19 = vsel %vm239_vm6, %v678_v18, -inf }
 0x3be   :  { %685 = vmax.xlane.f32.xlu2 %v684_v19  ;;  %v1238_v19 = vld [vmem:[#allocation5 + $0x28] sm:$0xff] }
 0x421   :  { %v556_v20 = vpop.xlane.xlu0 %555 }
 0x422   :  { %v558_v21 = vsub.f32 %v548_v11, %v556_v20  ;;  %v1237_v20 = vld [vmem:[#allocation5 + $0x20] sm:$0xff] }
 0x424   :  { %v561_v22 = vmul.f32 1.442695, %v558_v21  ;;  %v1236_v21 = vld [vmem:[#allocation5 + $0x18] sm:$0xff] }
 0x426   :  { %1331 = vpow2.f32 %v561_v22 }
 0x429   :  { %v683_v23 = vpop.xlane.xlu1 %682 }
 0x42a   :  { %v687_v24 = vsub.f32 %v650_v16, %v683_v23 }
 0x42c   :  { %v1332_v25 = vpop.eup %1331  ;;  %v689_v26 = vmul.f32 1.442695, %v687_v24  ;;  %v1235_v24 = vld [vmem:[#allocation5 + $0x10] sm:$0xff] }
 0x42d   :  { %v566_v27 = vsel %vm239_vm6, %v1332_v25, 0.0 }
 0x42e   :  { %1333 = vpow2.f32 %v689_v26  ;;  %567 = vadd.xlane.f32.xlu0 %v566_v27 }
 0x431   :  { %v686_v28 = vpop.xlane.xlu2 %685 }
 0x432   :  { %v688_v29 = vsub.f32 %v678_v18, %v686_v28  ;;  %v1240_v18 = vld [vmem:[#allocation5 + $0x38] sm:$0xff]  ;;  %v1234_v28 = vld [vmem:[#allocation5 + $0x8] sm:$0xff] }
 0x433   :  { %955 = vmatpush.bf16.msrb.mxu0 %v1240_v18 }
 0x434   :  { %v1334_v30 = vpop.eup %1333  ;;  %v691_v31 = vmul.f32 1.442695, %v688_v29 }
 0x435   :  { %v693_v32 = vsel %vm239_vm6, %v1334_v30, 0.0 }
 0x436   :  { %1335 = vpow2.f32 %v691_v31  ;;  %694 = vadd.xlane.f32.xlu1 %v693_v32  ;;  %v1233_v31 = vld [vmem:[#allocation5] sm:$0xff] }
 0x43c   :  { %v1336_v33 = vpop.eup %1335 }
 0x43d   :  { %v696_v34 = vsel %vm239_vm6, %v1336_v33, 0.0 }
 0x43e   :  { %697 = vadd.xlane.f32.xlu2 %v696_v34 }
 0x442   :  { %599 = vrot.lane.b32.xlu0 %v1589_v57, %s1464_s18 }
 0x44f   :  { %1280 = vrot.lane.b32.xlu1 %v1617_v12, %s1467_s20 }
 0x456   :  { %1285 = vrot.lane.b32.xlu2 %v1284_v13, %s1468_s21 }
 0x4a1   :  { %v568_v35 = vpop.xlane.xlu0 %567 }
 0x4a2   :  { %1337 = vrcp.f32 %v568_v35 }
 0x4a8   :  { %v1338_v36 = vpop.eup %1337 }
 0x4a9   :  { %v572_v37 = vmul.f32 %v1338_v36, %v1332_v25  ;;  %v695_v39 = vpop.xlane.xlu1 %694 }
 0x4aa   :  { %1339 = vrcp.f32 %v695_v39 }
 0x4b0   :  { %v1340_v41 = vpop.eup %1339 }
 0x4b1   :  { %v698_v40 = vpop.xlane.xlu2 %697  ;;  %v701_v44 = vmul.f32 %v1340_v41, %v1334_v30 }
 0x4b2   :  { %1341 = vrcp.f32 %v698_v40 }
 0x4b4   :  { %v600_v38 = vpop.permute.xlu0 %599 }
 0x4b5   :  { %620 = vmatpush.msra.mxu2 %v600_v38 }
 0x4b6   :  { %1143 = vmatmul.msk.f32.vlgmr.msra.gmra.mxu2 %vm239_vm6, %v572_v37 }
 0x4b8   :  { %v1342_v57 = vpop.eup %1341 }
 0x4b9   :  { %v702_v45 = vmul.f32 %v1342_v57, %v1336_v33  ;;  %v1286_v53 = vpop.permute.xlu2 %1285 }
 0x4ba   :  { %v1288_v55 = vunpack.i.h.bf16 %v1286_v53  ;;  %v1287_v56 = vunpack.i.l.bf16 %v1286_v53 }
 0x4bc   :  { %v780_v61 = vsel %vm239_vm6, %v1651_v8, %v1288_v55  ;;  %v779_v62 = vsel %vm239_vm6, %v1649_v7, %v1287_v56 }
 0x4c1   :  { %v1281_v42 = vpop.permute.xlu1 %1280 }
 0x4c2   :  { %v1283_v43 = vunpack.i.h.bf16 %v1281_v42  ;;  %v1282_v12 = vunpack.i.l.bf16 %v1281_v42 }
 0x4c4   :  { %724 = vmatpush.msrb.mxu2 %v1282_v12  ;;  %750 = vmatpush.msra.mxu3 %v1283_v43 }
 0x4c5   :  { %1148 = vmatmul.msk.f32.vlgmr.msrb.gmra.mxu2 %vm239_vm6, %v701_v44  ;;  %1149 = vmatmul.msk.f32.vlgmr.msra.gmra.mxu3 %vm239_vm6, %v702_v45 }
 0x539   :  { %v622_v46 = vpop.f32.mrf.mxu2 }
 0x53a   :  { %v1289_v47 = vpack.i.bf16 %v622_v46, %v596_v15 }
 0x53c   :  { %1290 = vrot.lane.b32.xlu0 %v1289_v47, %s1469_s5 }
 0x548   :  { %v726_v48 = vpop.f32.mrf.mxu2  ;;  %v752_v49 = vpop.f32.mrf.mxu3 }
 0x549   :  { %v1294_v50 = vpack.i.bf16 %v752_v49, %v726_v48 }
 0x54b   :  { %1295 = vrot.lane.b32.xlu1 %v1294_v50, %s1470_s22 }
 0x5ae   :  { %v1291_v54 = vpop.permute.xlu0 %1290 }
 0x5af   :  { %v1293_v58 = vunpack.i.h.bf16 %v1291_v54  ;;  %v1292_v59 = vunpack.i.l.bf16 %v1291_v54 }
 0x5b1   :  { %v782_v3 = vsel %vm781_vm7, %v779_v62, %v1292_v59  ;;  %v783_v4 = vsel %vm781_vm7, %v780_v61, %v1293_v58  ;;  %v1304_v59 = vld [vmem:[%s1723_s12] ss:$0 sm:$0xff] }
 0x5bd   :  { %v1296_v60 = vpop.permute.xlu1 %1295 }
 0x5be   :  { %v1298_v63 = vunpack.i.h.bf16 %v1296_v60  ;;  %v1297_v1 = vunpack.i.l.bf16 %v1296_v60 }
 0x5c0   :  { %v785_v5 = vsel %vm784_vm8, %v782_v3, %v1297_v1  ;;  %v786_v6 = vsel %vm784_vm8, %v783_v4, %v1298_v63  ;;  %v1248_v1 = vld [vmem:[#allocation7 + $0x38] sm:$0xff]  ;;  %v1247_v3 = vld [vmem:[#allocation7 + $0x30] sm:$0xff]  ;;  %v1246_v4 = vld [vmem:[#allocation7 + $0x28] sm:$0xff] }
 0x5c1   :  { %v787_v9 = vpack.c.bf16 %v786_v6, %v785_v5  ;;  %1056 = vmatpush.bf16.msra.mxu2 %v1248_v1  ;;  %v1245_v5 = vld [vmem:[#allocation7 + $0x20] sm:$0xff]  ;;  %v1244_v6 = vld [vmem:[#allocation7 + $0x18] sm:$0xff] }
 0x5c3   :  { %1158 = vmatmul.msk.bf16.vlgmr.msrb.gmra.mxu1 %vm808_vm9, %v787_v9  ;;  %v1243_v9 = vld [vmem:[#allocation7 + $0x10] sm:$0xff] }
 0x5c5   :  { %1057 = vmatpush.bf16.msra.mxu2 %v1247_v3 }
 0x5c9   :  { %1058 = vmatpush.bf16.msra.mxu2 %v1246_v4 }
 0x5cd   :  { %1059 = vmatpush.bf16.msra.mxu2 %v1245_v5 }
 0x5d1   :  { %1060 = vmatpush.bf16.msra.mxu2 %v1244_v6 }
 0x5d5   :  { %1061 = vmatpush.bf16.msra.mxu2 %v1243_v9 }
 0x640   :  { %v821_v11 = vpop.f32.mrf.mxu1 }
 0x641   :  { %v822_v13 = vadd.f32 %v1302_v10, %v821_v11  ;;  %v1241_v11 = vld [vmem:[#allocation7] sm:$0xff] }
 0x643   :  { %v1680_v8 = vadd.f32 %v822_v13, %v1561_v0  ;;  %v1239_v0 = vld [vmem:[#allocation5 + $0x30] sm:$0xff]  ;;  %v1305_v13 = vld [vmem:[%s1717_s6] ss:$0 sm:$0xff] }
 0x644   :  { %956 = vmatpush.bf16.msrb.mxu0 %v1239_v0 }
 0x645   :  { %830 = vadd.xlane.f32.xlu0 %v1680_v8  ;;  %v836_v7 = vmul.f32 %v1680_v8, %v1680_v8 }
 0x647   :  { %838 = vadd.xlane.f32.xlu1 %v836_v7 }
 0x648   :  { %v823_v14 = vpop.f32.mrf.mxu1  ;;  %957 = vmatpush.bf16.msrb.mxu0 %v1238_v19 }
 0x649   :  { %v824_v15 = vadd.f32 %v1302_v10, %v823_v14  ;;  %v1242_v10 = vld [vmem:[#allocation7 + $0x8] sm:$0xff] }
 0x64a   :  { %1062 = vmatpush.bf16.msra.mxu2 %v1242_v10 }
 0x64b   :  { %v1686_v16 = vadd.f32 %v824_v15, %v1569_v2 }
 0x64c   :  { %958 = vmatpush.bf16.msrb.mxu0 %v1237_v20 }
 0x64d   :  { %832 = vadd.xlane.f32.xlu2 %v1686_v16  ;;  %v837_v17 = vmul.f32 %v1686_v16, %v1686_v16 }
 0x64e   :  { %1063 = vmatpush.bf16.msra.mxu2 %v1241_v11 }
 0x64f   :  { %840 = vadd.xlane.f32.xlu0 %v837_v17 }
 0x650   :  { %959 = vmatpush.bf16.msrb.mxu0 %v1236_v21 }
 0x654   :  { %960 = vmatpush.bf16.msrb.mxu0 %v1235_v24 }
 0x658   :  { %961 = vmatpush.bf16.msrb.mxu0 %v1234_v28 }
 0x65c   :  { %962 = vmatpush.bf16.msrb.mxu0 %v1233_v31 }
 0x6b8   :  { %v831_v22 = vpop.xlane.xlu0 %830 }
 0x6b9   :  { %v834_v23 = vmul.f32 0.03125, %v831_v22 }
 0x6ba   :  { %v839_v2 = vpop.xlane.xlu1 %838 }
 0x6bb   :  { %v844_v25 = vmul.f32 %v834_v23, %v834_v23  ;;  %v842_v26 = vmul.f32 0.03125, %v839_v2  ;;  %v850_v49 = vsub.f32 %v1680_v8, %v834_v23 }
 0x6bd   :  { %v846_v27 = vsub.f32 %v842_v26, %v844_v25 }
 0x6bf   :  { %v848_v29 = vmax.f32 %v846_v27, 0.0 }
 0x6c0   :  { %v833_v30 = vpop.xlane.xlu2 %832 }
 0x6c1   :  { %v852_v32 = vadd.f32 1e-05, %v848_v29  ;;  %v835_v33 = vmul.f32 0.03125, %v833_v30 }
 0x6c2   :  { %v841_v34 = vpop.xlane.xlu0 %840 }
 0x6c3   :  { %1343 = vrsqrt.f32 %v852_v32  ;;  %v845_v35 = vmul.f32 %v835_v33, %v835_v33  ;;  %v843_v36 = vmul.f32 0.03125, %v841_v34  ;;  %vm860_vm11 = vweird.f32 %v852_v32 }
 0x6c4   :  { %v851_v54 = vsub.f32 %v1686_v16, %v835_v33 }
 0x6c5   :  { %v847_v37 = vsub.f32 %v843_v36, %v845_v35  ;;  %v1306_v35 = vld [vmem:[%s1719_s8] ss:$0 sm:$0xff] }
 0x6c7   :  { %v849_v38 = vmax.f32 %v847_v37, 0.0 }
 0x6c9   :  { %v1344_v39 = vpop.eup %1343  ;;  %v853_v41 = vadd.f32 1e-05, %v849_v38 }
 0x6ca   :  { %v855_v40 = vmul.f32 %v1344_v39, %v852_v32  ;;  %vm861_vm10 = vweird.f32 %v1344_v39 }
 0x6cb   :  { %1345 = vrsqrt.f32 %v853_v41  ;;  %vm862_vm12 = vmor %vm860_vm11, %vm861_vm10  ;;  %vm870_vm14 = vweird.f32 %v853_v41 }
 0x6cc   :  { %v856_v57 = vmul.f32 %v1344_v39, %v855_v40 }
 0x6ce   :  { %v857_v42 = vmul.f32 0.5, %v856_v57 }
 0x6d0   :  { %v858_v43 = vsub.f32 1.5, %v857_v42 }
 0x6d1   :  { %v1346_v12 = vpop.eup %1345 }
 0x6d2   :  { %v859_v44 = vmul.f32 %v1344_v39, %v858_v43  ;;  %v865_v45 = vmul.f32 %v1346_v12, %v853_v41  ;;  %vm871_vm13 = vweird.f32 %v1346_v12 }
 0x6d3   :  { %vm872_vm15 = vmor %vm870_vm14, %vm871_vm13 }
 0x6d4   :  { %v866_v46 = vmul.f32 %v1346_v12, %v865_v45  ;;  %v863_v47 = vsel %vm862_vm12, %v1344_v39, %v859_v44 }
 0x6d5   :  { %v874_v51 = vmul.f32 %v863_v47, %v850_v49 }
 0x6d6   :  { %v867_v48 = vmul.f32 0.5, %v866_v46 }
 0x6d7   :  { %v879_v58 = vmul.f32 %v1303_v52, %v874_v51 }
 0x6d8   :  { %v868_v50 = vsub.f32 1.5, %v867_v48 }
 0x6d9   :  { %v884_v61 = vadd.f32 %v1304_v59, %v879_v58 }
 0x6da   :  { %v869_v53 = vmul.f32 %v1346_v12, %v868_v50 }
 0x6dc   :  { %v873_v55 = vsel %vm872_vm15, %v1346_v12, %v869_v53 }
 0x6dd   :  { %v875_v56 = vmul.f32 %v873_v55, %v851_v54 }
 0x6df   :  { %v880_v60 = vmul.f32 %v1303_v52, %v875_v56 }
 0x6e1   :  { %v885_v62 = vadd.f32 %v1304_v59, %v880_v60 }
 0x6e3   :  { %v886_v63 = vpack.c.bf16 %v885_v62, %v884_v61 }
 0x6e5   :  { %963 = vmatmul.bf16.vlgmr.msrb.gmra.mxu0 %v886_v63 }
 0x762   :  { %v964_v7 = vpop.f32.mrf.mxu0 }
 0x763   :  { %v965_v14 = vadd.f32 %v1305_v13, %v964_v7 }
 0x765   :  { %v971_v15 = vmul.f32 0.044715, %v965_v14  ;;  %v969_v29 = vmul.f32 0.5, %v965_v14 }
 0x767   :  { %v973_v17 = vmul.f32 %v971_v15, %v965_v14 }
 0x769   :  { %v975_v18 = vmul.f32 %v973_v17, %v965_v14 }
 0x76a   :  { %v966_v0 = vpop.f32.mrf.mxu0 }
 0x76b   :  { %v977_v19 = vadd.f32 %v975_v18, %v965_v14  ;;  %v967_v20 = vadd.f32 %v1305_v13, %v966_v0 }
 0x76d   :  { %v972_v21 = vmul.f32 0.044715, %v967_v20  ;;  %v979_v22 = vmul.f32 0.7978846, %v977_v19  ;;  %v970_v30 = vmul.f32 0.5, %v967_v20 }
 0x76f   :  { %v974_v23 = vmul.f32 %v972_v21, %v967_v20  ;;  %1347 = vtanh.f32 %v979_v22 }
 0x771   :  { %v976_v2 = vmul.f32 %v974_v23, %v967_v20 }
 0x773   :  { %v978_v24 = vadd.f32 %v976_v2, %v967_v20 }
 0x775   :  { %v980_v25 = vmul.f32 0.7978846, %v978_v24  ;;  %v1348_v26 = vpop.eup %1347 }
 0x776   :  { %v983_v27 = vadd.f32 1.0, %v1348_v26 }
 0x777   :  { %1349 = vtanh.f32 %v980_v25 }
 0x778   :  { %v985_v32 = vmul.f32 %v983_v27, %v969_v29 }
 0x77d   :  { %v1350_v28 = vpop.eup %1349 }
 0x77e   :  { %v984_v31 = vadd.f32 1.0, %v1350_v28 }
 0x780   :  { %v986_v33 = vmul.f32 %v984_v31, %v970_v30 }
 0x782   :  { %v987_v34 = vpack.c.bf16 %v986_v33, %v985_v32 }
 0x784   :  { %1064 = vmatmul.bf16.vlgmr.msra.gmra.mxu2 %v987_v34 }
 0x807   :  { %v1065_v36 = vpop.f32.mrf.mxu2 }
 0x808   :  { %v1066_v37 = vadd.f32 %v1306_v35, %v1065_v36 }
 0x80a   :  { %v1070_v38 = vadd.f32 %v1066_v37, %v1680_v8 }
 0x80c   :  { %1072 = vst [vmem:[#allocation8] sm:$0xff] %v1070_v38 }
 0x80f   :  { %v1067_v39 = vpop.f32.mrf.mxu2 }
 0x810   :  { %v1068_v40 = vadd.f32 %v1306_v35, %v1067_v39 }
 0x812   :  { %v1071_v41 = vadd.f32 %v1068_v40, %v1686_v16 }
 0x814   :  { %1073 = vst [vmem:[#allocation8 + $0x8] sm:$0xff] %v1071_v41 }
 0x815   :  { %1086 = dma.vmem_to_hbm [thread:$0]  %s1079_s30, 256, %s1081_s10, [#allocation4], %s1472_s2, %s1472_s2, %s1468_s21  }
 0x816   :  { %1451 = dma.done.wait [#allocation4], 256  }
 0x817   :  { %1452 = vsyncadd [#allocation4], 4294967040 }
 0x818   :  { %1091 = vsyncpa [#allocation3], 1 }
 0x819   :  { %1092 = vsyncpa [#allocation6], 1 }
 0x81a   :  { %1093 = vsyncpa [#allocation4], 1 }

</bundles_post_ra>
